<compile_context>
chip_gen: v7x
topology: tpu7x:2x2x1
jax: 0.10.0
libtpu: 0.0.40
codegen_flags: <defaults>
</compile_context>

<pallas_src>
import math

import jax
import jax.numpy as jnp
from jax.experimental import pallas as pl
from jax.experimental.pallas import tpu as pltpu

_SUBLANE = 8


def _round_up(n, m):
    return ((n + m - 1) // m) * m


def _cdiv(a, b):
    return -(-a // b)


def _choose_batch_tile(B, tm_max=1024):
    """Pick (TM, grid_m) so each tile is <= tm_max rows, padding waste is
    bounded for mid-size B, and the grid has >= 2 steps when the batch is big
    enough (lets the batch axis shard across v7x's two TensorCores)."""
    n_tiles = max(1, _cdiv(B, tm_max))
    if n_tiles < 2 and B >= 2 * _SUBLANE:
        n_tiles = 2
    tm = _round_up(_cdiv(B, n_tiles), _SUBLANE)
    return tm, n_tiles


def agent_kernel(x_ref, mask_ref, w1_ref, w2_ref, w3_ref, w4_ref, out_ref):
    # fc1 (16 -> 512) + relu; bf16 operands, f32 accumulation.
    h = jnp.dot(x_ref[...].astype(jnp.bfloat16), w1_ref[...],
                preferred_element_type=jnp.float32)
    h = jnp.maximum(h, 0.0).astype(jnp.bfloat16)
    # fc2 (512 -> 32) + relu
    h = jnp.dot(h, w2_ref[...], preferred_element_type=jnp.float32)
    h = jnp.maximum(h, 0.0).astype(jnp.bfloat16)
    # fc3 (32 -> 32) + relu
    h = jnp.dot(h, w3_ref[...], preferred_element_type=jnp.float32)
    h = jnp.maximum(h, 0.0).astype(jnp.bfloat16)
    # fc4 (32 -> 4); kept at its real 4-wide shape (no lane padding).
    logits = jnp.dot(h, w4_ref[...], preferred_element_type=jnp.float32)
    # x[mask == 0] = -inf
    logits = jnp.where(mask_ref[...] != 0.0, logits, -jnp.inf)
    # softmax over the 4 moves
    m = jnp.max(logits, axis=1, keepdims=True)
    e = jnp.exp(logits - m)
    denom = jnp.sum(e, axis=1, keepdims=True)
    inv = pl.reciprocal(denom, approx=True)   # EUP slot, nearly free
    inv = inv * (2.0 - denom * inv)           # one Newton step -> ~f32 accuracy
    out_ref[...] = (e * inv).astype(out_ref.dtype)
    # NOTE: rows whose real mask is all-zero produce NaN (all -inf logits),
    # matching the PyTorch reference; caller guarantees >= 1 legal move.


def agent_forward(x, mask, params, *, tm_max=1024):
    """x: (B, 4, 4) or (B, 16) float32; mask: (B, 4) {0,1}; returns (B, 4) probs."""
    # TODO(synk): handle_symmetries=True path (dihedral augmentation + untransform)
    # not implemented; this is the handle_symmetries=False forward.
    w1, w2, w3, w4 = params  # (16,512), (512,32), (32,32), (32,4) bf16
    x2 = x.reshape(-1, 16).astype(jnp.float32)
    mask2 = mask.reshape(-1, 4).astype(jnp.float32)
    B = x2.shape[0]

    tm, grid_m = _choose_batch_tile(B, tm_max)
    b_pad = tm * grid_m
    if b_pad > B:
        # Tail-only padding. Padded mask rows are all-ones so their (discarded)
        # softmax stays finite.
        x2 = jnp.pad(x2, ((0, b_pad - B), (0, 0)))
        mask2 = jnp.pad(mask2, ((0, b_pad - B), (0, 0)), constant_values=1.0)

    out = pl.pallas_call(
        agent_kernel,
        out_shape=jax.ShapeDtypeStruct((b_pad, 4), jnp.float32),
        grid=(grid_m,),
        in_specs=[
            pl.BlockSpec((tm, 16), lambda i: (i, 0)),    # x tile   (pipelined)
            pl.BlockSpec((tm, 4), lambda i: (i, 0)),     # mask tile (pipelined)
            pl.BlockSpec((16, 512), lambda i: (0, 0)),   # W1 (VMEM-resident)
            pl.BlockSpec((512, 32), lambda i: (0, 0)),   # W2 (VMEM-resident)
            pl.BlockSpec((32, 32), lambda i: (0, 0)),    # W3 (VMEM-resident)
            pl.BlockSpec((32, 4), lambda i: (0, 0)),     # W4 (VMEM-resident)
        ],
        out_specs=pl.BlockSpec((tm, 4), lambda i: (i, 0)),
        compiler_params=pltpu.CompilerParams(
            dimension_semantics=("parallel",),
        ),
    )(x2, mask2, w1, w2, w3, w4)
    return out[:B]


def init_params(key):
    """Deterministic init matching the PyTorch module's __init__ (shapes/dists)."""
    k1, k2, k3, k4 = jax.random.split(key, 4)

    def kaiming_uniform(k, out_f, in_f):
        # kaiming_uniform_(mode='fan_in', nonlinearity='relu'):
        # bound = gain * sqrt(3 / fan_in), gain = sqrt(2)
        bound = math.sqrt(2.0) * math.sqrt(3.0 / in_f)
        w = jax.random.uniform(k, (out_f, in_f), jnp.float32, -bound, bound)
        return w.T  # store as (in, out) for x @ W

    w1 = kaiming_uniform(k1, 512, 16)
    w2 = kaiming_uniform(k2, 32, 512)
    w3 = kaiming_uniform(k3, 32, 32)
    w4 = jax.random.uniform(k4, (4, 32), jnp.float32, -0.01, 0.01).T  # (32, 4)
    # bf16 weights: bf16-native MXU operands; accumulation stays f32 in-kernel.
    return tuple(w.astype(jnp.bfloat16) for w in (w1, w2, w3, w4))


def reference_forward(x, mask, params):
    """Pure-JAX f32 reference (same quantized weights, f32 activations)."""
    w1, w2, w3, w4 = (w.astype(jnp.float32) for w in params)
    h = x.reshape(-1, 16).astype(jnp.float32)
    h = jax.nn.relu(h @ w1)
    h = jax.nn.relu(h @ w2)
    h = jax.nn.relu(h @ w3)
    logits = h @ w4
    logits = jnp.where(mask == 0.0, -jnp.inf, logits)
    return jax.nn.softmax(logits, axis=1)


if __name__ == "__main__":
    key = jax.random.PRNGKey(0)
    kp, kx, km = jax.random.split(key, 3)

    params = init_params(kp)

    B = 8  # small batch of 4x4 boards
    x = jax.random.normal(kx, (B, 4, 4), jnp.float32)
    mask = (jax.random.uniform(km, (B, 4)) > 0.3).astype(jnp.float32)
    mask = mask.at[:, 0].set(1.0)  # guarantee at least one legal move per row

    out = agent_forward(x, mask, params)
    out = jax.block_until_ready(out)

    ref = reference_forward(x, mask, params)
    assert out.shape == (B, 4)
    # bf16 activations in-kernel vs f32 reference: tolerance in the 1e-3 range.
    assert jnp.allclose(out, ref, atol=2e-3, rtol=0.0), "mismatch vs reference"
    # probabilities sum to 1 over dim=1
    assert jnp.allclose(jnp.sum(out, axis=1), 1.0, atol=1e-3)

    print("KERNEL_OK")
</pallas_src>

<mosaic_0001>
module attributes {stable_mosaic.version = 11 : i64} {
  func.func @agent_kernel(%arg0: i32, %arg1: memref<8x16xf32, #tpu.memory_space<vmem>>, %arg2: memref<8x4xf32, #tpu.memory_space<vmem>>, %arg3: memref<16x512xbf16, #tpu.memory_space<vmem>>, %arg4: memref<512x32xbf16, #tpu.memory_space<vmem>>, %arg5: memref<32x32xbf16, #tpu.memory_space<vmem>>, %arg6: memref<32x4xbf16, #tpu.memory_space<vmem>>, %arg7: memref<8x4xf32, #tpu.memory_space<vmem>>) attributes {dimension_semantics = [#tpu.dimension_semantics<parallel>], iteration_bounds = array<i64: 1>, scalar_prefetch = 0 : i64, scratch_operands = 0 : i64, tpu.core_type = #tpu.core_type<tc>, window_params = [{transform_indices = @transform_0, window_bounds = array<i64: 8, 16>}, {transform_indices = @transform_1, window_bounds = array<i64: 8, 4>}, {pipeline_mode = #tpu.pipeline_mode<synchronous>, transform_indices = @transform_2, window_bounds = array<i64: 16, 512>}, {pipeline_mode = #tpu.pipeline_mode<synchronous>, transform_indices = @transform_3, window_bounds = array<i64: 512, 32>}, {pipeline_mode = #tpu.pipeline_mode<synchronous>, transform_indices = @transform_4, window_bounds = array<i64: 32, 32>}, {pipeline_mode = #tpu.pipeline_mode<synchronous>, transform_indices = @transform_5, window_bounds = array<i64: 32, 4>}, {transform_indices = @transform_6, window_bounds = array<i64: 8, 4>}]} {
    %c0 = arith.constant 0 : index
    %c0_0 = arith.constant 0 : index
    %0 = vector.load %arg1[%c0, %c0_0] : memref<8x16xf32, #tpu.memory_space<vmem>>, vector<8x16xf32>
    %1 = arith.truncf %0 : vector<8x16xf32> to vector<8x16xbf16>
    %c0_1 = arith.constant 0 : index
    %c0_2 = arith.constant 0 : index
    %2 = vector.load %arg3[%c0_1, %c0_2] : memref<16x512xbf16, #tpu.memory_space<vmem>>, vector<16x512xbf16>
    %cst = arith.constant dense<0.000000e+00> : vector<8x512xf32>
    %3 = tpu.matmul %1, %2, %cst {dimension_numbers = #tpu.dot_dimension_numbers<[1], [0], [0], [1], [0, 0, 1, 1], [], []>} : vector<8x16xbf16>, vector<16x512xbf16>, vector<8x512xf32> -> vector<8x512xf32>
    %cst_3 = arith.constant 0.000000e+00 : f32
    %4 = vector.broadcast %cst_3 : f32 to vector<8x512xf32>
    %5 = arith.maximumf %3, %4 : vector<8x512xf32>
    %6 = arith.truncf %5 : vector<8x512xf32> to vector<8x512xbf16>
    %c0_4 = arith.constant 0 : index
    %c0_5 = arith.constant 0 : index
    %7 = vector.load %arg4[%c0_4, %c0_5] : memref<512x32xbf16, #tpu.memory_space<vmem>>, vector<512x32xbf16>
    %cst_6 = arith.constant dense<0.000000e+00> : vector<8x32xf32>
    %8 = tpu.matmul %6, %7, %cst_6 {dimension_numbers = #tpu.dot_dimension_numbers<[1], [0], [0], [1], [0, 0, 1, 1], [], []>} : vector<8x512xbf16>, vector<512x32xbf16>, vector<8x32xf32> -> vector<8x32xf32>
    %cst_7 = arith.constant 0.000000e+00 : f32
    %9 = vector.broadcast %cst_7 : f32 to vector<8x32xf32>
    %10 = arith.maximumf %8, %9 : vector<8x32xf32>
    %11 = arith.truncf %10 : vector<8x32xf32> to vector<8x32xbf16>
    %c0_8 = arith.constant 0 : index
    %c0_9 = arith.constant 0 : index
    %12 = vector.load %arg5[%c0_8, %c0_9] : memref<32x32xbf16, #tpu.memory_space<vmem>>, vector<32x32xbf16>
    %cst_10 = arith.constant dense<0.000000e+00> : vector<8x32xf32>
    %13 = tpu.matmul %11, %12, %cst_10 {dimension_numbers = #tpu.dot_dimension_numbers<[1], [0], [0], [1], [0, 0, 1, 1], [], []>} : vector<8x32xbf16>, vector<32x32xbf16>, vector<8x32xf32> -> vector<8x32xf32>
    %cst_11 = arith.constant 0.000000e+00 : f32
    %14 = vector.broadcast %cst_11 : f32 to vector<8x32xf32>
    %15 = arith.maximumf %13, %14 : vector<8x32xf32>
    %16 = arith.truncf %15 : vector<8x32xf32> to vector<8x32xbf16>
    %c0_12 = arith.constant 0 : index
    %c0_13 = arith.constant 0 : index
    %17 = vector.load %arg6[%c0_12, %c0_13] : memref<32x4xbf16, #tpu.memory_space<vmem>>, vector<32x4xbf16>
    %cst_14 = arith.constant dense<0.000000e+00> : vector<8x4xf32>
    %18 = tpu.matmul %16, %17, %cst_14 {dimension_numbers = #tpu.dot_dimension_numbers<[1], [0], [0], [1], [0, 0, 1, 1], [], []>} : vector<8x32xbf16>, vector<32x4xbf16>, vector<8x4xf32> -> vector<8x4xf32>
    %c0_15 = arith.constant 0 : index
    %c0_16 = arith.constant 0 : index
    %19 = vector.load %arg2[%c0_15, %c0_16] : memref<8x4xf32, #tpu.memory_space<vmem>>, vector<8x4xf32>
    %cst_17 = arith.constant 0.000000e+00 : f32
    %20 = vector.broadcast %cst_17 : f32 to vector<8x4xf32>
    %21 = arith.cmpf one, %19, %20 : vector<8x4xf32>
    %cst_18 = arith.constant 0xFF800000 : f32
    %22 = vector.broadcast %cst_18 : f32 to vector<8x4xf32>
    %23 = arith.select %21, %18, %22 : vector<8x4xi1>, vector<8x4xf32>
    %cst_19 = arith.constant dense<0xFF800000> : vector<8xf32>
    %24 = vector.multi_reduction <maximumf>, %23, %cst_19 [1] : vector<8x4xf32> to vector<8xf32>
    %25 = vector.shape_cast %24 : vector<8xf32> to vector<8x1xf32>
    %26 = vector.broadcast %25 : vector<8x1xf32> to vector<8x4xf32>
    %27 = arith.subf %23, %26 : vector<8x4xf32>
    %28 = math.exp %27 : vector<8x4xf32>
    %cst_20 = arith.constant dense<0.000000e+00> : vector<8xf32>
    %29 = vector.multi_reduction <add>, %28, %cst_20 [1] : vector<8x4xf32> to vector<8xf32>
    %30 = vector.shape_cast %29 : vector<8xf32> to vector<8x1xf32>
    %31 = tpu.reciprocal %30 {approx = true} : vector<8x1xf32> -> vector<8x1xf32>
    %32 = arith.mulf %30, %31 : vector<8x1xf32>
    %cst_21 = arith.constant 2.000000e+00 : f32
    %33 = vector.broadcast %cst_21 : f32 to vector<8x1xf32>
    %34 = arith.subf %33, %32 : vector<8x1xf32>
    %35 = arith.mulf %31, %34 : vector<8x1xf32>
    %36 = vector.broadcast %35 : vector<8x1xf32> to vector<8x4xf32>
    %37 = arith.mulf %28, %36 : vector<8x4xf32>
    %c0_22 = arith.constant 0 : index
    %c0_23 = arith.constant 0 : index
    %38 = vector.load %arg7[%c0_22, %c0_23] : memref<8x4xf32, #tpu.memory_space<vmem>>, vector<8x4xf32>
    tpu.vector_store %arg7[%c0_22, %c0_23], %37 {strides = array<i32>} : memref<8x4xf32, #tpu.memory_space<vmem>>, vector<8x4xf32>,
    return
  }
  func.func @transform_0(%arg0: i32) -> (i32, i32) {
    %c0_i32 = arith.constant 0 : i32
    %c0_i32_0 = arith.constant 0 : i32
    return %arg0, %c0_i32 : i32, i32
  }
  func.func @transform_1(%arg0: i32) -> (i32, i32) {
    %c0_i32 = arith.constant 0 : i32
    %c0_i32_0 = arith.constant 0 : i32
    return %arg0, %c0_i32 : i32, i32
  }
  func.func @transform_2(%arg0: i32) -> (i32, i32) {
    %c0_i32 = arith.constant 0 : i32
    %c0_i32_0 = arith.constant 0 : i32
    %c0_i32_1 = arith.constant 0 : i32
    return %c0_i32, %c0_i32_0 : i32, i32
  }
  func.func @transform_3(%arg0: i32) -> (i32, i32) {
    %c0_i32 = arith.constant 0 : i32
    %c0_i32_0 = arith.constant 0 : i32
    %c0_i32_1 = arith.constant 0 : i32
    return %c0_i32, %c0_i32_0 : i32, i32
  }
  func.func @transform_4(%arg0: i32) -> (i32, i32) {
    %c0_i32 = arith.constant 0 : i32
    %c0_i32_0 = arith.constant 0 : i32
    %c0_i32_1 = arith.constant 0 : i32
    return %c0_i32, %c0_i32_0 : i32, i32
  }
  func.func @transform_5(%arg0: i32) -> (i32, i32) {
    %c0_i32 = arith.constant 0 : i32
    %c0_i32_0 = arith.constant 0 : i32
    %c0_i32_1 = arith.constant 0 : i32
    return %c0_i32, %c0_i32_0 : i32, i32
  }
  func.func @transform_6(%arg0: i32) -> (i32, i32) {
    %c0_i32 = arith.constant 0 : i32
    %c0_i32_0 = arith.constant 0 : i32
    return %arg0, %c0_i32 : i32, i32
  }
}

</mosaic_0001>

<bundles_post_ra>
// kernel: tpu_custom_call.1
= control target key start
LH: loop header
LB: loop body
LE: loop exit
PB: predicated region body
PF: predicated region fallthrough
CT: control target
= control target key end

     0   :  { %v785_v1 = vmov 0   ;;  %vm50_vm0 = vcmask 130048   ;;  %v786_v56 = vmov 0.0   ;;  %vm787_vm1 = vmmov 0   ;;  %s955_s2 = inlined_call_operand.vmem [shape: bf16[16,512], index: 2, kind: input, shape index: {}]   ;;  %s956_s0 = inlined_call_operand.vmem [shape: f32[8,16], index: 0, kind: input, shape index: {}]   ;;  %s957_s3 = inlined_call_operand.vmem [shape: bf16[512,32], index: 3, kind: input, shape index: {}]   ;;  %s958_s4 = inlined_call_operand.vmem [shape: bf16[32,32], index: 4, kind: input, shape index: {}]   ;;  %s959_s5 = inlined_call_operand.vmem [shape: bf16[32,4], index: 5, kind: input, shape index: {}]   ;;  %s960_s1 = inlined_call_operand.vmem [shape: f32[8,4], index: 1, kind: input, shape index: {}]   ;;  %s961_s6 = inlined_call_operand.vmem [shape: f32[8,4], index: 6, kind: output, shape index: {}]  }
   0x1   :  { %v739_v0 = vld [vmem:[%s955_s2 + $0x4] ss:$16 sps:$4 sm:$0xff]   ;;  %86 = vmatprep.mubr.bf16.mxu0 %v785_v1  ;;  %127 = vmatprep.mubr.bf16.mxu1 %v785_v1  ;;  %v741_v2 = vld [vmem:[%s955_s2 + $0xc] ss:$16 sps:$4 sm:$0xff]   ;;  %v743_v3 = vld [vmem:[%s955_s2] ss:$16 sps:$4 sm:$0xff]  }
   0x2   :  { %54 = vmatprep.subr.bf16.mxu0 %v739_v0  ;;  %v744_v4 = vld [vmem:[%s955_s2 + $0x8] ss:$16 sps:$4 sm:$0xff]   ;;  %v24_v5 = vld [vmem:[%s956_s0] sm:$0xff]  ;;  %95 = vmatprep.subr.bf16.mxu1 %v741_v2  ;;  %v753_v15 = vld [vmem:[%s957_s3 + $0x50] sm:$0xff]   ;;  %vm498_vm2 = vcmask 261120   ;;  %vm606_vm4 = vcmask 31744  }
   0x3   :  { %v25_v6 = vpack.c.bf16 %v24_v5, %v24_v5  ;;  %v745_v7 = vld [vmem:[%s957_s3 + $0x40] sm:$0xff]   ;;  %55 = vmatpush1.bf16.msra.mxu0 %v743_v3  ;;  %96 = vmatpush1.bf16.msra.mxu1 %v744_v4  ;;  %v749_v11 = vld [vmem:[%s957_s3 + $0x48] sm:$0xff]   ;;  %v754_v16 = vld [vmem:[%s957_s3 + $0xd0] sm:$0xff]  }
   0x4   :  { %v746_v8 = vld [vmem:[%s957_s3 + $0xc0] sm:$0xff]   ;;  %670 = vmatprep.subr.bf16.mxu0 %v745_v7  ;;  %v750_v12 = vld [vmem:[%s957_s3 + $0xc8] sm:$0xff]   ;;  %v755_v17 = vld [vmem:[%s957_s3 + $0x10] sm:$0xff]  }
   0x5   :  { %v747_v9 = vld [vmem:[%s957_s3] sm:$0xff]   ;;  %692 = vmatprep.subr.bf16.mxu1 %v746_v8  ;;  %v751_v13 = vld [vmem:[%s957_s3 + $0x8] sm:$0xff]   ;;  %v756_v18 = vld [vmem:[%s957_s3 + $0x90] sm:$0xff]  }
   0x6   :  { %v748_v10 = vld [vmem:[%s957_s3 + $0x80] sm:$0xff]   ;;  %630 = vmatmul.mubr.msk.bf16.vlgmr.msra.gmra.mrb[0].mxu0 %vm50_vm0, %v25_v6  ;;  %631 = vmatmul.mubr.msk.bf16.vlgmr.msra.gmra.mrb[0].mxu1 %vm50_vm0, %v25_v6  ;;  %v752_v14 = vld [vmem:[%s957_s3 + $0x88] sm:$0xff]   ;;  %v757_v19 = vld [vmem:[%s957_s3 + $0x58] sm:$0xff]  }
   0x7   :  { %671 = vmatpush3.bf16.msra.mxu0 %v747_v9  ;;  %693 = vmatpush3.bf16.msra.mxu1 %v748_v10  ;;  %v758_v20 = vld [vmem:[%s957_s3 + $0xd8] sm:$0xff]   ;;  %v761_v23 = vld [vmem:[%s957_s3 + $0x60] sm:$0xff]   ;;  %v765_v27 = vld [vmem:[%s957_s3 + $0x68] sm:$0xff]  }
   0x8   :  { %672 = vmatprep.subr.bf16.mxu0 %v749_v11  ;;  %694 = vmatprep.subr.bf16.mxu1 %v750_v12  ;;  %v759_v21 = vld [vmem:[%s957_s3 + $0x18] sm:$0xff]   ;;  %v762_v24 = vld [vmem:[%s957_s3 + $0xe0] sm:$0xff]   ;;  %v766_v28 = vld [vmem:[%s957_s3 + $0xe8] sm:$0xff]  }
   0x9   :  { %v760_v22 = vld [vmem:[%s957_s3 + $0x98] sm:$0xff]   ;;  %v763_v25 = vld [vmem:[%s957_s3 + $0x20] sm:$0xff]   ;;  %v767_v29 = vld [vmem:[%s957_s3 + $0x28] sm:$0xff]  }
   0xa   :  { %v764_v26 = vld [vmem:[%s957_s3 + $0xa0] sm:$0xff]   ;;  %v768_v30 = vld [vmem:[%s957_s3 + $0xa8] sm:$0xff]   ;;  %v769_v31 = vld [vmem:[%s957_s3 + $0x70] sm:$0xff]  }
   0xb   :  { %673 = vmatpush3.bf16.msra.mxu0 %v751_v13  ;;  %695 = vmatpush3.bf16.msra.mxu1 %v752_v14  ;;  %v770_v32 = vld [vmem:[%s957_s3 + $0xf0] sm:$0xff]   ;;  %v773_v35 = vld [vmem:[%s957_s3 + $0x78] sm:$0xff]   ;;  %v777_v55 = vld [vmem:[%s958_s4] sm:$0xff]  }
   0xc   :  { %674 = vmatprep.subr.bf16.mxu0 %v753_v15  ;;  %696 = vmatprep.subr.bf16.mxu1 %v754_v16  ;;  %v771_v33 = vld [vmem:[%s957_s3 + $0x30] sm:$0xff]   ;;  %v774_v36 = vld [vmem:[%s957_s3 + $0xf8] sm:$0xff]   ;;  %v778_v57 = vld [vmem:[%s958_s4 + $0x8] sm:$0xff]  }
   0xd   :  { %v772_v34 = vld [vmem:[%s957_s3 + $0xb0] sm:$0xff]   ;;  %v775_v37 = vld [vmem:[%s957_s3 + $0x38] sm:$0xff]   ;;  %v779_v58 = vld [vmem:[%s959_s5] sm:$0xff]  }
   0xe   :  { %v776_v38 = vld [vmem:[%s957_s3 + $0xb8] sm:$0xff]   ;;  %v780_v8 = vld [vmem:[%s959_s5 + $0x8] sm:$0xff]   ;;  %v603_v15 = vld [vmem:[%s960_s1] sm:$0xff] }
   0xf   :  { %675 = vmatpush3.bf16.msra.mxu0 %v755_v17  ;;  %697 = vmatpush3.bf16.msra.mxu1 %v756_v18  ;;  %vm604_vm3 = vcmp.ne.f32.partialorder %v603_v15, 0.0 }
  0x10   :  { %676 = vmatprep.subr.bf16.mxu0 %v757_v19  ;;  %698 = vmatprep.subr.bf16.mxu1 %v758_v20 }
  0x13   :  { %677 = vmatpush3.bf16.msra.mxu0 %v759_v21  ;;  %699 = vmatpush3.bf16.msra.mxu1 %v760_v22 }
  0x14   :  { %678 = vmatprep.subr.bf16.mxu0 %v761_v23  ;;  %700 = vmatprep.subr.bf16.mxu1 %v762_v24 }
  0x17   :  { %679 = vmatpush3.bf16.msra.mxu0 %v763_v25  ;;  %701 = vmatpush3.bf16.msra.mxu1 %v764_v26 }
  0x18   :  { %680 = vmatprep.subr.bf16.mxu0 %v765_v27  ;;  %702 = vmatprep.subr.bf16.mxu1 %v766_v28 }
  0x1b   :  { %681 = vmatpush3.bf16.msra.mxu0 %v767_v29  ;;  %703 = vmatpush3.bf16.msra.mxu1 %v768_v30 }
  0x1c   :  { %682 = vmatprep.subr.bf16.mxu0 %v769_v31  ;;  %704 = vmatprep.subr.bf16.mxu1 %v770_v32 }
  0x1f   :  { %683 = vmatpush3.bf16.msra.mxu0 %v771_v33  ;;  %705 = vmatpush3.bf16.msra.mxu1 %v772_v34 }
  0x20   :  { %684 = vmatprep.subr.bf16.mxu0 %v773_v35  ;;  %706 = vmatprep.subr.bf16.mxu1 %v774_v36 }
  0x23   :  { %685 = vmatpush3.bf16.msra.mxu0 %v775_v37  ;;  %707 = vmatpush3.bf16.msra.mxu1 %v776_v38 }
  0x24   :  { %720 = vmatprep.subr.bf16.mxu0 %v786_v56  ;;  %728 = vmatprep.subr.bf16.mxu1 %v786_v56 }
  0xd9   :  { %v88_v39 = vpop.f32.mrb[0].mxu0  ;;  %v129_v40 = vpop.f32.mrb[0].mxu1 }
  0xda   :  { %v136_v41 = vmax.f32 %v88_v39, 0.0  ;;  %v138_v42 = vmax.f32 %v129_v40, 0.0  ;;  %v90_v43 = vpop.f32.mrb[1].mxu0  ;;  %v131_v44 = vpop.f32.mrb[1].mxu1 }
  0xdb   :  { %v137_v45 = vmax.f32 %v90_v43, 0.0  ;;  %v139_v46 = vmax.f32 %v131_v44, 0.0  ;;  %v92_v47 = vpop.f32.mrb[2].mxu0  ;;  %v133_v48 = vpop.f32.mrb[2].mxu1 }
  0xdc   :  { %v93_v49 = vpop.f32.mrb[3].mxu0  ;;  %v134_v50 = vpop.f32.mrb[3].mxu1  ;;  %v140_v53 = vpack.c.bf16 %v136_v41, %v136_v41  ;;  %v142_v54 = vpack.c.bf16 %v138_v42, %v138_v42 }
  0xdd   :  { %v141_v51 = vpack.c.bf16 %v137_v45, %v137_v45  ;;  %v143_v52 = vpack.c.bf16 %v139_v46, %v139_v46 }
  0xdf   :  { %432 = vmatprep.mubr.bf16.mxu0 %v141_v51  ;;  %472 = vmatprep.mubr.bf16.mxu1 %v143_v52 }
  0xe0   :  { %433 = vmatmul.mubr.bf16.vlgmr.msra.gmra.mrb[4].mxu0 %v140_v53  ;;  %473 = vmatmul.mubr.bf16.vlgmr.msra.gmra.mrb[4].mxu1 %v142_v54 }
  0xe1   :  { %721 = vmatpush3.bf16.msra.mxu0 %v777_v55  ;;  %724 = vmatprep.mubr.msk.bf16.mxu0 %vm787_vm1, %v786_v56 }
  0xe2   :  { %722 = vmatprep.subr.bf16.mxu0 %v786_v56  ;;  %732 = vmatprep.mubr.msk.bf16.mxu1 %vm787_vm1, %v786_v56 }
  0xe3   :  { %729 = vmatpush3.bf16.msra.mxu1 %v779_v58 }
  0xe4   :  { %730 = vmatprep.subr.bf16.mxu1 %v786_v56 }
  0xe5   :  { %723 = vmatpush3.bf16.msra.mxu0 %v778_v57 }
  0xe7   :  { %731 = vmatpush3.bf16.msra.mxu1 %v780_v8 }
 0x1b3   :  { %v686_v59 = vpop.f32.mrb[4].mxu0  ;;  %v708_v60 = vpop.f32.mrb[4].mxu1 }
 0x1b4   :  { %v687_v61 = vpop.f32.mrb[5].mxu0  ;;  %v709_v62 = vpop.f32.mrb[5].mxu1 }
 0x1b5   :  { %v688_v63 = vadd.f32 %v687_v61, %v686_v59  ;;  %v710_v0 = vadd.f32 %v709_v62, %v708_v60  ;;  %v689_v1 = vpop.f32.mrb[6].mxu0  ;;  %v711_v2 = vpop.f32.mrb[6].mxu1 }
 0x1b6   :  { %v690_v3 = vpop.f32.mrb[7].mxu0  ;;  %v712_v4 = vpop.f32.mrb[7].mxu1 }
 0x1b7   :  { %v475_v5 = vadd.f32 %v710_v0, %v688_v63 }
 0x1b9   :  { %v480_v6 = vmax.f32 %v475_v5, 0.0 }
 0x1bb   :  { %v481_v7 = vpack.c.bf16 %v480_v6, %v480_v6 }
 0x1bd   :  { %725 = vmatmul.mubr.msk.bf16.vlgmr.msra.gmra.mrb[8].mxu0 %vm498_vm2, %v481_v7 }
 0x290   :  { %v536_v9 = vpop.f32.mrb[8].mxu0 }
 0x291   :  { %v542_v10 = vmax.f32 %v536_v9, 0.0  ;;  %v726_v11 = vpop.f32.mrb[9].mxu0 }
 0x292   :  { %v539_v12 = vpop.f32.mrb[10].mxu0 }
 0x293   :  { %v543_v13 = vpack.c.bf16 %v542_v10, %v542_v10  ;;  %v727_v14 = vpop.f32.mrb[11].mxu0 }
 0x295   :  { %733 = vmatmul.mubr.msk.bf16.vlgmr.msra.gmra.mrb[8].mxu1 %vm498_vm2, %v543_v13 }
 0x368   :  { %v597_v16 = vpop.f32.mrb[8].mxu1 }
 0x369   :  { %v605_v17 = vsel %vm604_vm3, %v597_v16, -inf  ;;  %v734_v18 = vpop.f32.mrb[9].mxu1 }
 0x36a   :  { %v600_v19 = vpop.f32.mrb[10].mxu1  ;;  %v607_v20 = vsel %vm606_vm4, %v605_v17, -inf }
 0x36b   :  { %608 = vmax.xlane.f32.xlu0 %v607_v20  ;;  %v735_v21 = vpop.f32.mrb[11].mxu1 }
 0x3f8   :  { %v609_v22 = vpop.xlane.xlu0 %608 }
 0x3f9   :  { %v610_v23 = vsub.f32 %v605_v17, %v609_v22 }
 0x3fb   :  { %v611_v24 = vmul.f32 1.442695, %v610_v23 }
 0x3fd   :  { %781 = vpow2.f32 %v611_v24 }
 0x407   :  { %v782_v25 = vpop.eup %781 }
 0x408   :  { %v613_v26 = vsel %vm606_vm4, %v782_v25, 0.0 }
 0x409   :  { %614 = vadd.xlane.f32.xlu0 %v613_v26 }
 0x496   :  { %v615_v27 = vpop.xlane.xlu0 %614 }
 0x497   :  { %783 = vrcp.f32 %v615_v27 }
 0x4a1   :  { %v784_v28 = vpop.eup %783 }
 0x4a2   :  { %v617_v29 = vmul.f32 %v784_v28, %v615_v27 }
 0x4a4   :  { %v618_v30 = vsub.f32 2.0, %v617_v29 }
 0x4a6   :  { %v619_v31 = vmul.f32 %v784_v28, %v618_v30 }
 0x4a8   :  { %v620_v32 = vmul.f32 %v782_v25, %v619_v31 }
 0x4aa   :  { %621 = vst.msk [vmem:[%s961_s6] sm:$0xff] %vm606_vm4, %v620_v32 }

</bundles_post_ra>
